<compile_context>
chip_gen: v6e
topology: v6e:2x2x1
jax: 0.10.0
libtpu: 0.0.40
codegen_flags: <defaults>
</compile_context>

<pallas_src>
import math

import jax
import jax.numpy as jnp
from jax.experimental import pallas as pl
from jax.experimental.pallas import tpu as pltpu


def _linear_rbf_kernel(x_ref, w_ref, b_ref, o_ref, acc_ref):
    """One (tm, tn) output tile, accumulated over the K grid axis.

    x_ref  : (tm, tk)             activations tile
    w_ref  : (tk, tn)             weight tile, pre-transposed to (K, N)
    b_ref  : (1, tn)  f32         bias tile
    o_ref  : (tm, tn)             output tile
    acc_ref: (tm, tn) f32 VMEM    accumulator (persists across the K axis)
    """
    k = pl.program_id(2)
    nk = pl.num_programs(2)

    # Fold bias into the accumulator init (saves a VPU add in the epilogue).
    @pl.when(k == 0)
    def _init():
        acc_ref[...] = jnp.broadcast_to(b_ref[...], acc_ref.shape)

    # MXU matmul in the operand dtype, f32 accumulation (kept in-register here).
    acc = acc_ref[...] + jnp.dot(
        x_ref[...], w_ref[...], preferred_element_type=jnp.float32
    )

    # Non-final K steps: store partial sum back to the VMEM accumulator.
    @pl.when(k < nk - 1)
    def _store():
        acc_ref[...] = acc

    # Final K step: exp(-(z*z)) straight from the in-register sum (no acc reload).
    @pl.when(k == nk - 1)
    def _epilogue():
        o_ref[...] = jnp.exp(-(acc * acc)).astype(o_ref.dtype)


def _round_up(x, m):
    return (x + m - 1) // m * m


def _pick_tile_and_pad(dim, preferred, align):
    """Pick the largest preferred tile <= round_up(dim, align); pad dim to tile."""
    base = _round_up(dim, align)
    tile = base
    for t in preferred:  # preferred is sorted descending
        if t <= base:
            tile = t
            break
    return tile, _round_up(dim, tile)


def _pad2d(a, rows, cols):
    r, c = a.shape
    if rows == r and cols == c:
        return a
    return jnp.pad(a, ((0, rows - r), (0, cols - c)))


def _tile_vmem_bytes(tm, tn, tk, in_bytes, out_bytes):
    return (
        2 * (tm * tk + tk * tn) * in_bytes  # x, W tiles (double buffered)
        + 2 * tn * 4                        # bias tile (double buffered)
        + 2 * tm * tn * out_bytes           # output tile (double buffered)
        + tm * tn * 4                       # f32 accumulator scratch
    )


def _vmem_budget_bytes():
    """~75% of the physical per-core VMEM; conservative 64 MiB fallback (v7x)."""
    try:
        cap = pltpu.get_tpu_info().vmem_capacity_bytes
    except Exception:
        cap = 64 << 20
    return (3 * int(cap)) // 4


def linear_rbf(x, weight, bias, *, mxu_dtype=jnp.bfloat16):
    """x: (B, in), weight: (out, in) [PyTorch layout], bias: (out,) -> (B, out).

    MXU operands are fed as `mxu_dtype` (bf16 by default); accumulation, bias add
    and exp stay float32.  Pass mxu_dtype=None for a bit-exact f32 feed.
    """
    B, K = x.shape
    N, K2 = weight.shape
    assert K == K2, (x.shape, weight.shape)
    out_dtype = x.dtype
    out_bytes = jnp.dtype(out_dtype).itemsize

    # One-time transpose of the weight to (K, N) so the kernel does the canonical
    # (M,K)x(K,N) contraction (keeps the MXU feed in its preferred layout).
    w_t = weight.T
    if mxu_dtype is not None:
        x = x.astype(mxu_dtype)
        w_t = w_t.astype(mxu_dtype)
    in_bytes = jnp.dtype(x.dtype).itemsize

    # ---- Tile selection -----------------------------------------------------
    # 256-multiples for tn/tk keep the 2x256x256 MXU (v6e/v7x) full; larger tk
    # amortizes per-grid-step overhead and accumulator RMW traffic (bf16 tiles
    # are cheap in VMEM).  tm stays sublane-aligned.
    tk_pref = (1024, 512, 256, 128) if in_bytes <= 2 else (512, 256, 128)
    tm, Bp = _pick_tile_and_pad(B, (256, 128, 64, 32, 16, 8), 8)
    tn, Np = _pick_tile_and_pad(N, (512, 256, 128), 128)
    tk, Kp = _pick_tile_and_pad(K, tk_pref, 128)

    # Megacore (v7x has 2 TensorCores): make sure the two "parallel" axes expose
    # at least 2 blocks when the shape allows it.
    if (Bp // tm) * (Np // tn) == 1:
        if tn >= 256:
            tn //= 2
        elif tm >= 16:
            tm //= 2

    # Clamp tiles so everything (incl. double buffering) fits the per-generation
    # VMEM budget (v7x: 64 MiB physical).
    budget = _vmem_budget_bytes()
    while _tile_vmem_bytes(tm, tn, tk, in_bytes, out_bytes) > budget:
        if tk > 128:
            tk //= 2
        elif tn > 128:
            tn //= 2
        elif tm > 8:
            tm //= 2
        else:
            break

    # ---- Zero-pad operands to tile multiples (exact for this op) ------------
    x_p = _pad2d(x, Bp, Kp)                                   # zero rows/cols -> 0 contribution
    w_p = _pad2d(w_t, Kp, Np)
    b_p = _pad2d(bias.reshape(1, N).astype(jnp.float32), 1, Np)

    grid = (Bp // tm, Np // tn, Kp // tk)
    gi, gj, _gk = grid

    tile_vmem = _tile_vmem_bytes(tm, tn, tk, in_bytes, out_bytes)
    vmem_limit = int(min(max(tile_vmem * 2, 32 << 20), budget))

    # Advisory cost: count actual HBM traffic including operand re-reads
    # (x is streamed once per j-block, W once per i-block).
    cost = pl.CostEstimate(
        flops=2 * Bp * Kp * Np,
        transcendentals=Bp * Np,
        bytes_accessed=(
            gj * Bp * Kp * in_bytes      # x re-read per output-column block
            + gi * Np * Kp * in_bytes    # W re-read per output-row block
            + gi * Np * 4                # bias
            + Bp * Np * out_bytes        # output
        ),
    )

    out_padded = pl.pallas_call(
        _linear_rbf_kernel,
        out_shape=jax.ShapeDtypeStruct((Bp, Np), out_dtype),
        grid=grid,
        in_specs=[
            pl.BlockSpec((tm, tk), lambda i, j, k: (i, k)),   # x
            pl.BlockSpec((tk, tn), lambda i, j, k: (k, j)),   # W^T (K, N)
            pl.BlockSpec((1, tn), lambda i, j, k: (0, j)),    # bias
        ],
        out_specs=pl.BlockSpec((tm, tn), lambda i, j, k: (i, j)),
        scratch_shapes=[pltpu.VMEM((tm, tn), jnp.float32)],
        compiler_params=pltpu.CompilerParams(
            dimension_semantics=("parallel", "parallel", "arbitrary"),
            vmem_limit_bytes=vmem_limit,
        ),
        cost_estimate=cost,
    )(x_p, w_p, b_p)

    if (Bp, Np) != (B, N):
        return out_padded[:B, :N]
    return out_padded


def _reference(x, weight, bias):
    return jnp.exp(-jnp.square(x @ weight.T + bias))


def _rand_problem(key, B, K, N):
    k_x, k_w, k_b = jax.random.split(key, 3)
    bound = 1.0 / math.sqrt(K)
    x = jax.random.normal(k_x, (B, K), dtype=jnp.float32)
    w = jax.random.uniform(k_w, (N, K), minval=-bound, maxval=bound, dtype=jnp.float32)
    b = jax.random.uniform(k_b, (N,), minval=-bound, maxval=bound, dtype=jnp.float32)
    return x, w, b


if __name__ == "__main__":
    # --- small shapes consistent with nn.Linear(in_features, out_features) ---
    batch, in_features, out_features = 8, 32, 128
    x, weight, bias = _rand_problem(jax.random.PRNGKey(0), batch, in_features, out_features)
    ref = _reference(x, weight, bias)

    # Default path: bf16 MXU feed, f32 accumulate/epilogue.
    out = jax.block_until_ready(linear_rbf(x, weight, bias))
    assert out.shape == (batch, out_features)
    assert jnp.allclose(out, ref, atol=5e-2, rtol=5e-2), "bf16 path mismatch"

    # Exact f32 feed path.
    out_f32 = jax.block_until_ready(linear_rbf(x, weight, bias, mxu_dtype=None))
    assert jnp.allclose(out_f32, ref, atol=1e-5, rtol=1e-5), "f32 path mismatch"

    # Larger shape: multi-step K reduction + >=2 parallel-axis blocks (megacore).
    x2, w2, b2 = _rand_problem(jax.random.PRNGKey(1), 256, 1024, 512)
    ref2 = _reference(x2, w2, b2)
    out2_f32 = jax.block_until_ready(linear_rbf(x2, w2, b2, mxu_dtype=None))
    assert jnp.allclose(out2_f32, ref2, atol=1e-4, rtol=1e-4), "tiled f32 path mismatch"
    out2_bf16 = jax.block_until_ready(linear_rbf(x2, w2, b2))
    assert jnp.allclose(out2_bf16, ref2, atol=5e-2, rtol=5e-2), "tiled bf16 path mismatch"

    # Awkward, non-divisible shape exercising the zero-padded tiling.
    x3, w3, b3 = _rand_problem(jax.random.PRNGKey(2), 10, 50, 200)
    ref3 = _reference(x3, w3, b3)
    out3 = jax.block_until_ready(linear_rbf(x3, w3, b3, mxu_dtype=None))
    assert out3.shape == (10, 200)
    assert jnp.allclose(out3, ref3, atol=1e-5, rtol=1e-5), "padded f32 path mismatch"

    print("KERNEL_OK")
</pallas_src>

<mosaic_0001>
module attributes {stable_mosaic.version = 11 : i64} {
  func.func @_linear_rbf_kernel(%arg0: i32, %arg1: i32, %arg2: i32, %arg3: memref<8x128xbf16, #tpu.memory_space<vmem>>, %arg4: memref<128x128xbf16, #tpu.memory_space<vmem>>, %arg5: memref<1x128xf32, #tpu.memory_space<vmem>>, %arg6: memref<8x128xf32, #tpu.memory_space<vmem>>, %arg7: memref<8x128xf32, #tpu.memory_space<vmem>>) attributes {dimension_semantics = [#tpu.dimension_semantics<parallel>, #tpu.dimension_semantics<parallel>, #tpu.dimension_semantics<arbitrary>], iteration_bounds = array<i64: 1, 1, 1>, scalar_prefetch = 0 : i64, scratch_operands = 1 : i64, tpu.core_type = #tpu.core_type<tc>, window_params = [{transform_indices = @transform_0, window_bounds = array<i64: 8, 128>}, {transform_indices = @transform_1, window_bounds = array<i64: 128, 128>}, {transform_indices = @transform_2, window_bounds = array<i64: 1, 128>}, {transform_indices = @transform_3, window_bounds = array<i64: 8, 128>}]} {
    %c0_i32 = arith.constant 0 : i32
    %0 = arith.cmpi eq, %arg2, %c0_i32 : i32
    %1 = arith.extui %0 : i1 to i32
    %c0_i32_0 = arith.constant 0 : i32
    %2 = arith.cmpi ne, %1, %c0_i32_0 : i32
    scf.if %2 {
      %c0_10 = arith.constant 0 : index
      %c0_11 = arith.constant 0 : index
      %14 = vector.load %arg5[%c0_10, %c0_11] : memref<1x128xf32, #tpu.memory_space<vmem>>, vector<1x128xf32>
      %15 = vector.shape_cast %14 : vector<1x128xf32> to vector<1x128xf32>
      %16 = vector.broadcast %15 : vector<1x128xf32> to vector<8x128xf32>
      %c0_12 = arith.constant 0 : index
      %c0_13 = arith.constant 0 : index
      %17 = vector.load %arg7[%c0_12, %c0_13] : memref<8x128xf32, #tpu.memory_space<vmem>>, vector<8x128xf32>
      tpu.vector_store %arg7[%c0_12, %c0_13], %16 {strides = array<i32>} : memref<8x128xf32, #tpu.memory_space<vmem>>, vector<8x128xf32>,
    } else {
    }
    %c0 = arith.constant 0 : index
    %c0_1 = arith.constant 0 : index
    %3 = vector.load %arg7[%c0, %c0_1] : memref<8x128xf32, #tpu.memory_space<vmem>>, vector<8x128xf32>
    %c0_2 = arith.constant 0 : index
    %c0_3 = arith.constant 0 : index
    %4 = vector.load %arg3[%c0_2, %c0_3] : memref<8x128xbf16, #tpu.memory_space<vmem>>, vector<8x128xbf16>
    %c0_4 = arith.constant 0 : index
    %c0_5 = arith.constant 0 : index
    %5 = vector.load %arg4[%c0_4, %c0_5] : memref<128x128xbf16, #tpu.memory_space<vmem>>, vector<128x128xbf16>
    %cst = arith.constant dense<0.000000e+00> : vector<8x128xf32>
    %6 = tpu.matmul %4, %5, %cst {dimension_numbers = #tpu.dot_dimension_numbers<[1], [0], [0], [1], [0, 0, 1, 1], [], []>} : vector<8x128xbf16>, vector<128x128xbf16>, vector<8x128xf32> -> vector<8x128xf32>
    %7 = arith.addf %3, %6 : vector<8x128xf32>
    %c0_i32_6 = arith.constant 0 : i32
    %8 = arith.cmpi slt, %arg2, %c0_i32_6 : i32
    %9 = arith.extui %8 : i1 to i32
    %c0_i32_7 = arith.constant 0 : i32
    %10 = arith.cmpi ne, %9, %c0_i32_7 : i32
    scf.if %10 {
      %c0_10 = arith.constant 0 : index
      %c0_11 = arith.constant 0 : index
      %14 = vector.load %arg7[%c0_10, %c0_11] : memref<8x128xf32, #tpu.memory_space<vmem>>, vector<8x128xf32>
      tpu.vector_store %arg7[%c0_10, %c0_11], %7 {strides = array<i32>} : memref<8x128xf32, #tpu.memory_space<vmem>>, vector<8x128xf32>,
    } else {
    }
    %c0_i32_8 = arith.constant 0 : i32
    %11 = arith.cmpi eq, %arg2, %c0_i32_8 : i32
    %12 = arith.extui %11 : i1 to i32
    %c0_i32_9 = arith.constant 0 : i32
    %13 = arith.cmpi ne, %12, %c0_i32_9 : i32
    scf.if %13 {
      %14 = arith.mulf %7, %7 : vector<8x128xf32>
      %cst_10 = arith.constant 0.000000e+00 : f32
      %15 = vector.broadcast %cst_10 : f32 to vector<8x128xf32>
      %16 = arith.subf %15, %14 : vector<8x128xf32>
      %17 = math.exp %16 : vector<8x128xf32>
      %c0_11 = arith.constant 0 : index
      %c0_12 = arith.constant 0 : index
      %18 = vector.load %arg6[%c0_11, %c0_12] : memref<8x128xf32, #tpu.memory_space<vmem>>, vector<8x128xf32>
      tpu.vector_store %arg6[%c0_11, %c0_12], %17 {strides = array<i32>} : memref<8x128xf32, #tpu.memory_space<vmem>>, vector<8x128xf32>,
    } else {
    }
    return
  }
  func.func @transform_0(%arg0: i32, %arg1: i32, %arg2: i32) -> (i32, i32) {
    %c0_i32 = arith.constant 0 : i32
    return %arg0, %arg2 : i32, i32
  }
  func.func @transform_1(%arg0: i32, %arg1: i32, %arg2: i32) -> (i32, i32) {
    %c0_i32 = arith.constant 0 : i32
    return %arg2, %arg1 : i32, i32
  }
  func.func @transform_2(%arg0: i32, %arg1: i32, %arg2: i32) -> (i32, i32) {
    %c0_i32 = arith.constant 0 : i32
    %c0_i32_0 = arith.constant 0 : i32
    return %c0_i32, %arg1 : i32, i32
  }
  func.func @transform_3(%arg0: i32, %arg1: i32, %arg2: i32) -> (i32, i32) {
    %c0_i32 = arith.constant 0 : i32
    return %arg0, %arg1 : i32, i32
  }
}

</mosaic_0001>

<bundles_post_ra>
// kernel: tpu_custom_call.1
= control target key start
LH: loop header
LB: loop body
LE: loop exit
PB: predicated region body
PF: predicated region fallthrough
CT: control target
= control target key end

     0   :  { %8 = vsyncpa [#allocation4], 0  ;;  %s350_s0 = inlined_call_operand.hbm [shape: bf16[8,128], index: 0, kind: input, shape index: {}]   ;;  %s351_s1 = inlined_call_operand.hbm [shape: bf16[128,128], index: 1, kind: input, shape index: {}]   ;;  %s352_s2 = inlined_call_operand.vmem [shape: f32[1,128], index: 2, kind: input, shape index: {}]   ;;  %s353_s3 = inlined_call_operand.hbm [shape: f32[8,128], index: 3, kind: output, shape index: {}]  }
   0x1   :  { %9 = vsyncpa [#allocation7], 0 }
   0x2   :  { %10 = vsyncpa [#allocation5], 0  ;;  %s311_s12 = smov [#allocation3]   ;;  %s312_s14 = smov [#allocation6]  }
   0x3   :  { %s17_s13 = sshll.u32 %s311_s12, 4  ;;  %s26_s15 = sshll.u32 %s312_s14, 4  ;;  %s18_s13 = int_to_ptr.vmem [resolvable:$true] %s17_s13  ;;  %s27_s15 = int_to_ptr.vmem [resolvable:$true] %s26_s15 }
   0x4   :  { %s253_s16 = scalar_lea.vmem %s18_s13, 64  ;;  %p258_p1 = scmp.lt.s32.totalorder %s18_s13, %s18_s13 }
   0x5   :  { %p254_p0 = scmp.ne.s32.totalorder %s18_s13, %s253_s16  ;;  %p259_p2 = scmp.lt.s32.totalorder %s253_s16, %s253_s16 }
   0x7   :  { %p260_p3 = por %p259_p2, %p258_p1 }
   0x9   :  { %p261_p4 = pnand %p260_p3, %p254_p0 }
   0xb   :  { %264 = shalt.err (!%p261_p4)
}
   0xc   :  { %20 = dma.hbm_to_vmem [thread:$0]  %s350_s0, 64, %s18_s13, [#allocation4]  }
   0xd   :  { %s273_s19 = scalar_lea.vmem %s27_s15, 1024  ;;  %p278_p6 = scmp.lt.s32.totalorder %s27_s15, %s27_s15 }
   0xe   :  { %p274_p5 = scmp.ne.s32.totalorder %s27_s15, %s273_s19  ;;  %p279_p7 = scmp.lt.s32.totalorder %s273_s19, %s273_s19 }
  0x10   :  { %p280_p8 = por %p279_p7, %p278_p6 }
  0x12   :  { %p281_p9 = pnand %p280_p8, %p274_p5 }
  0x14   :  { %284 = shalt.err (!%p281_p9)
}
  0x15   :  { %s313_s20 = smov 64   ;;  %s314_s21 = smov 4  }
  0x16   :  { %32 = dma.hbm_to_vmem [thread:$0]  %s351_s1, 1024, %s27_s15, [#allocation7], %s313_s20, %s313_s20, %s314_s21  }
  0x17   :  { %305 = dma.done.wait [#allocation4], 64  }
  0x18   :  { %306 = vsyncadd [#allocation4], 4294967232 }
  0x19   :  { %307 = dma.done.wait [#allocation7], 1024  }
  0x1a   :  { %308 = vsyncadd [#allocation7], 4294966272  ;;  %v315_v0 = vmov 0.0   ;;  %vm316_vm0 = vmmov 0   ;;  %v235_v1 = vld [vmem:[#allocation6 + $0x38] sm:$0xff]   ;;  %v236_v2 = vld [vmem:[#allocation6 + $0x30] sm:$0xff]  }
  0x1b   :  { %208 = vmatprep.subr.bf16.mxu0 %v315_v0  ;;  %224 = vmatprep.mubr.msk.bf16.mxu0 %vm316_vm0, %v315_v0  ;;  %v237_v3 = vld [vmem:[#allocation6 + $0x28] sm:$0xff]   ;;  %v238_v4 = vld [vmem:[#allocation6 + $0x20] sm:$0xff]   ;;  %v239_v5 = vld [vmem:[#allocation6 + $0x18] sm:$0xff]   ;;  %s317_s24 = smov [#allocation8]  }
  0x1c   :  { %209 = vmatpush3.bf16.msra.mxu0 %v235_v1  ;;  %v240_v6 = vld [vmem:[#allocation6 + $0x10] sm:$0xff]   ;;  %v241_v7 = vld [vmem:[#allocation6 + $0x8] sm:$0xff]   ;;  %v242_v8 = vld [vmem:[#allocation6] sm:$0xff]   ;;  %s180_s25 = sshll.u32 %s317_s24, 4  ;;  %s181_s25 = int_to_ptr.vmem [resolvable:$true] %s180_s25 }
  0x1d   :  { %210 = vmatprep.subr.bf16.mxu0 %v315_v0  ;;  %v55_v9 = vld [vmem:[#allocation3] sm:$0xf]  ;;  %s285_s26 = scalar_lea.vmem %s181_s25, 128  ;;  %p290_p11 = scmp.lt.s32.totalorder %s181_s25, %s181_s25 }
  0x1e   :  { %v190_v10 = vld [vmem:[%s352_s2] ss:$0 sm:$0xff]  ;;  %p286_p10 = scmp.ne.s32.totalorder %s181_s25, %s285_s26  ;;  %p291_p12 = scmp.lt.s32.totalorder %s285_s26, %s285_s26 }
  0x20   :  { %211 = vmatpush3.bf16.msra.mxu0 %v236_v2  ;;  %p292_p13 = por %p291_p12, %p290_p11 }
  0x21   :  { %212 = vmatprep.subr.bf16.mxu0 %v315_v0 }
  0x22   :  { %p293_p0 = pnand %p292_p13, %p286_p10 }
  0x24   :  { %213 = vmatpush3.bf16.msra.mxu0 %v237_v3 }
  0x25   :  { %214 = vmatprep.subr.bf16.mxu0 %v315_v0 }
  0x28   :  { %215 = vmatpush3.bf16.msra.mxu0 %v238_v4 }
  0x29   :  { %216 = vmatprep.subr.bf16.mxu0 %v315_v0 }
  0x2c   :  { %217 = vmatpush3.bf16.msra.mxu0 %v239_v5 }
  0x2d   :  { %218 = vmatprep.subr.bf16.mxu0 %v315_v0 }
  0x30   :  { %219 = vmatpush3.bf16.msra.mxu0 %v240_v6 }
  0x31   :  { %220 = vmatprep.subr.bf16.mxu0 %v315_v0 }
  0x34   :  { %221 = vmatpush3.bf16.msra.mxu0 %v241_v7 }
  0x35   :  { %222 = vmatprep.subr.bf16.mxu0 %v315_v0 }
  0x38   :  { %223 = vmatpush3.bf16.msra.mxu0 %v242_v8 }
  0x3b   :  { %225 = vmatmul.mubr.bf16.vlgmr.msra.gmra.mxu0 %v55_v9 }
  0xfb   :  { %v154_v11 = vpop.f32.mrf.mxu0 }
  0xfc   :  { %v160_v12 = vadd.f32 %v190_v10, %v154_v11 }
  0xfd   :  { %v226_v13 = vpop.f32.mrf.mxu0 }
  0xfe   :  { %v169_v14 = vmul.f32 %v160_v12, %v160_v12 }
  0xff   :  { %v157_v15 = vpop.f32.mrf.mxu0 }
 0x100   :  { %v170_v16 = vsub.f32 0.0, %v169_v14 }
 0x101   :  { %v227_v17 = vpop.f32.mrf.mxu0 }
 0x102   :  { %v171_v18 = vmul.f32 1.442695, %v170_v16 }
 0x104   :  { %243 = vpow2.f32 %v171_v18 }
 0x111   :  { %v244_v19 = vpop.eup %243 }
 0x112   :  { %173 = vst [vmem:[#allocation8] sm:$0xff] %v244_v19 }
 0x113   :  { %296 = shalt.err (!%p293_p0)
}
 0x114   :  { %183 = dma.vmem_to_hbm [thread:$0]  %s181_s25, 128, %s353_s3, [#allocation5]  }
 0x115   :  { %309 = dma.done.wait [#allocation5], 128  }
 0x116   :  { %310 = vsyncadd [#allocation5], 4294967168 }
 0x117   :  { %187 = vsyncpa [#allocation4], 1 }
 0x118   :  { %188 = vsyncpa [#allocation7], 1 }
 0x119   :  { %189 = vsyncpa [#allocation5], 1 }

</bundles_post_ra>
